<compile_context>
chip_gen: v6e
topology: v6e:2x2x1
jax: 0.10.0
libtpu: 0.0.40
codegen_flags: <defaults>
</compile_context>

<pallas_src>
import jax
import jax.numpy as jnp
from jax.experimental import pallas as pl
from jax.experimental.pallas import tpu as pltpu

_LANES = (1024, 512, 256, 128)            # candidate lane widths (desc.)
_TINY_BYPASS_BYTES = 256 * 1024           # below this, plain XLA fusion wins
_TARGET_TILE_BYTES = 2 * 1024 * 1024      # ~2 MiB/input tile: flat roofline region


def _fusion_kernel(s_ref, x1_ref, x2_ref, o_ref):
    # s_ref: (2,) f32 in SMEM -> [a, b] with a = 1/(1+w), b = w/(1+w).
    # Compute in the input dtype (no forced f32 upcast): halves vreg pressure for
    # bf16 on v6e/v7x; Mosaic handles bf16 arithmetic lowering on v5e.
    a = s_ref[0].astype(x1_ref.dtype)
    b = s_ref[1].astype(x1_ref.dtype)
    o_ref[...] = (x1_ref[...] * a + x2_ref[...] * b).astype(o_ref.dtype)


def _round_up(x: int, m: int) -> int:
    return (x + m - 1) // m * m


def _pick_lane(total: int):
    """Largest lane in _LANES dividing `total`, preferring rows >= 8."""
    best = None
    for lane in _LANES:
        if total % lane == 0:
            if best is None:
                best = lane
            if total // lane >= 8:
                return lane
    return best


def _fusion_pallas_2d(x1f, x2f, scalars, total: int, lane: int):
    dtype = x1f.dtype
    itemsize = jnp.dtype(dtype).itemsize
    rows = total // lane
    x1_2d = x1f.reshape(rows, lane)   # pure relayout of a contiguous array: no copy
    x2_2d = x2f.reshape(rows, lane)

    # ~2 MiB tile, but keep >= ~4 grid steps when possible so v7x's 2 TensorCores
    # can shard the "parallel" axis; never allocate a tile larger than the array.
    tm_target = _round_up(max(1, _TARGET_TILE_BYTES // (lane * itemsize)), 8)
    tm_split = _round_up(pl.cdiv(rows, 4), 8)
    tm = max(8, min(tm_target, tm_split, _round_up(rows, 8)))
    grid = (pl.cdiv(rows, tm),)       # ragged last block handled by Pallas masking

    tile_spec = pl.BlockSpec((tm, lane), lambda i: (i, 0))

    out_2d = pl.pallas_call(
        _fusion_kernel,
        out_shape=jax.ShapeDtypeStruct((rows, lane), dtype),
        grid=grid,
        in_specs=[
            pl.BlockSpec(memory_space=pltpu.MemorySpace.SMEM),  # scalars (2,) f32
            tile_spec,                                          # x1 tile
            tile_spec,                                          # x2 tile
        ],
        out_specs=tile_spec,
        compiler_params=pltpu.CompilerParams(
            dimension_semantics=("parallel",),
            vmem_limit_bytes=32 * 1024 * 1024,
        ),
        cost_estimate=pl.CostEstimate(
            flops=3 * total,
            transcendentals=0,
            bytes_accessed=3 * total * itemsize,
        ),
    )(scalars, x1_2d, x2_2d)
    return out_2d.reshape(-1)


def fusion_forward(x1: jax.Array, x2: jax.Array, w, *, force_pallas: bool = False):
    """x1, x2: same-shape float arrays. w: scalar float parameter (default 0.1)."""
    assert x1.shape == x2.shape and x1.dtype == x2.dtype
    orig_shape, dtype = x1.shape, x1.dtype
    total = x1.size
    itemsize = jnp.dtype(dtype).itemsize

    # Scalars precomputed once: a = 1/(1+w), b = w/(1+w) = w*a.
    w32 = jnp.asarray(w, jnp.float32)
    a32 = 1.0 / (1.0 + w32)
    b32 = w32 * a32
    scalars = jnp.stack([a32, b32])   # (2,) f32, lives in SMEM inside the kernel

    def _plain(u1, u2):
        return (u1.astype(jnp.float32) * a32 + u2.astype(jnp.float32) * b32).astype(dtype)

    # Tiny-input bypass: kernel-launch + grid-step overhead dominates; XLA's own
    # elementwise fusion is already at the HBM floor.
    if total * itemsize < _TINY_BYPASS_BYTES and not force_pallas:
        return _plain(x1, x2)

    lane = _pick_lane(total)
    if lane is None:
        # Non-128-divisible element count (rare for NN tensors): padding or
        # slice/concat would add full extra HBM passes on a mem-bound op, so use
        # XLA's fused elementwise path instead (same 3-pass traffic).
        # TODO(synk): in-kernel masked tail store via scalar-prefetched valid count.
        return _plain(x1, x2)

    out = _fusion_pallas_2d(x1.reshape(-1), x2.reshape(-1), scalars, total, lane)
    return out.reshape(orig_shape)


if __name__ == "__main__":
    key = jax.random.PRNGKey(0)
    k1, k2, k3, k4, k5, k6 = jax.random.split(key, 6)

    # Deterministic parameter init, matching nn.Parameter(torch.tensor(0.1)).
    w = jnp.float32(0.1)

    def ref_fn(a1, a2):
        return a1 * 1.0 / (1.0 + w) + a2 * w / (w + 1.0)

    # 1) Main demo shape (small, image-like), forcing the Pallas path.
    x1 = jax.random.normal(k1, (2, 4, 16, 16), dtype=jnp.float32)
    x2 = jax.random.normal(k2, (2, 4, 16, 16), dtype=jnp.float32)
    out = jax.block_until_ready(fusion_forward(x1, x2, w, force_pallas=True))
    ref = ref_fn(x1, x2)
    assert out.shape == ref.shape and out.dtype == ref.dtype
    assert jnp.allclose(out, ref, rtol=1e-5, atol=1e-6)

    # 2) Rows not a multiple of the tile -> multi-step grid + ragged last block.
    y1 = jax.random.normal(k3, (2, 4, 16, 24), dtype=jnp.float32)
    y2 = jax.random.normal(k4, (2, 4, 16, 24), dtype=jnp.float32)
    out2 = jax.block_until_ready(fusion_forward(y1, y2, w, force_pallas=True))
    assert jnp.allclose(out2, ref_fn(y1, y2), rtol=1e-5, atol=1e-6)

    # 3) Non-128-divisible element count -> plain-XLA fallback branch.
    z1 = jax.random.normal(k5, (3, 5, 7), dtype=jnp.float32)
    z2 = jax.random.normal(k6, (3, 5, 7), dtype=jnp.float32)
    out3 = jax.block_until_ready(fusion_forward(z1, z2, w, force_pallas=True))
    assert jnp.allclose(out3, ref_fn(z1, z2), rtol=1e-5, atol=1e-6)

    print("KERNEL_OK")
</pallas_src>

<mosaic_0001>
module attributes {stable_mosaic.version = 11 : i64} {
  func.func @_fusion_kernel(%arg0: i32, %arg1: memref<2xf32, #tpu.memory_space<smem>>, %arg2: memref<8x256xf32, #tpu.memory_space<vmem>>, %arg3: memref<8x256xf32, #tpu.memory_space<vmem>>, %arg4: memref<8x256xf32, #tpu.memory_space<vmem>>) attributes {dimension_semantics = [#tpu.dimension_semantics<parallel>], iteration_bounds = array<i64: 1>, scalar_prefetch = 0 : i64, scratch_operands = 0 : i64, tpu.core_type = #tpu.core_type<tc>, window_params = [{transform_indices = @transform_0, window_bounds = array<i64: 2>}, {transform_indices = @transform_1, window_bounds = array<i64: 8, 256>}, {transform_indices = @transform_2, window_bounds = array<i64: 8, 256>}, {transform_indices = @transform_3, window_bounds = array<i64: 8, 256>}]} {
    %c0 = arith.constant 0 : index
    %0 = memref.load %arg1[%c0] : memref<2xf32, #tpu.memory_space<smem>>
    %c1 = arith.constant 1 : index
    %1 = memref.load %arg1[%c1] : memref<2xf32, #tpu.memory_space<smem>>
    %c0_0 = arith.constant 0 : index
    %c0_1 = arith.constant 0 : index
    %2 = vector.load %arg2[%c0_0, %c0_1] : memref<8x256xf32, #tpu.memory_space<vmem>>, vector<8x256xf32>
    %3 = vector.broadcast %0 : f32 to vector<8x256xf32>
    %4 = arith.mulf %2, %3 : vector<8x256xf32>
    %c0_2 = arith.constant 0 : index
    %c0_3 = arith.constant 0 : index
    %5 = vector.load %arg3[%c0_2, %c0_3] : memref<8x256xf32, #tpu.memory_space<vmem>>, vector<8x256xf32>
    %6 = vector.broadcast %1 : f32 to vector<8x256xf32>
    %7 = arith.mulf %5, %6 : vector<8x256xf32>
    %8 = arith.addf %4, %7 : vector<8x256xf32>
    %c0_4 = arith.constant 0 : index
    %c0_5 = arith.constant 0 : index
    %9 = vector.load %arg4[%c0_4, %c0_5] : memref<8x256xf32, #tpu.memory_space<vmem>>, vector<8x256xf32>
    tpu.vector_store %arg4[%c0_4, %c0_5], %8 {strides = array<i32>} : memref<8x256xf32, #tpu.memory_space<vmem>>, vector<8x256xf32>,
    return
  }
  func.func @transform_0(%arg0: i32) -> i32 {
    %c0_i32 = arith.constant 0 : i32
    %c0_i32_0 = arith.constant 0 : i32
    return %c0_i32 : i32
  }
  func.func @transform_1(%arg0: i32) -> (i32, i32) {
    %c0_i32 = arith.constant 0 : i32
    %c0_i32_0 = arith.constant 0 : i32
    return %arg0, %c0_i32 : i32, i32
  }
  func.func @transform_2(%arg0: i32) -> (i32, i32) {
    %c0_i32 = arith.constant 0 : i32
    %c0_i32_0 = arith.constant 0 : i32
    return %arg0, %c0_i32 : i32, i32
  }
  func.func @transform_3(%arg0: i32) -> (i32, i32) {
    %c0_i32 = arith.constant 0 : i32
    %c0_i32_0 = arith.constant 0 : i32
    return %arg0, %c0_i32 : i32, i32
  }
}

</mosaic_0001>

<bundles_post_ra>
// kernel: tpu_custom_call.1
= control target key start
LH: loop header
LB: loop body
LE: loop exit
PB: predicated region body
PF: predicated region fallthrough
CT: control target
= control target key end

     0   :  { %8 = vsyncpa [#allocation5], 0  ;;  %s200_s0 = inlined_call_operand.hbm [shape: f32[2], index: 0, kind: input, shape index: {}]   ;;  %s201_s1 = inlined_call_operand.hbm [shape: f32[8,256], index: 1, kind: input, shape index: {}]   ;;  %s202_s2 = inlined_call_operand.hbm [shape: f32[8,256], index: 2, kind: input, shape index: {}]   ;;  %s203_s3 = inlined_call_operand.hbm [shape: f32[8,256], index: 3, kind: output, shape index: {}]  }
   0x1   :  { %9 = vsyncpa [#allocation3], 0 }
   0x2   :  { %10 = vsyncpa [#allocation8], 0 }
   0x3   :  { %11 = vsyncpa [#allocation4], 0  ;;  %s164_s12 = smov [#allocation2]   ;;  %s165_s15 = smov [#allocation6]  }
   0x4   :  { %19 = dma.hbm_to_smem %s200_s0, 16, %s164_s12, [#allocation5]  }
   0x5   :  { %s26_s16 = sshll.u32 %s165_s15, 4  ;;  %s166_s17 = smov [#allocation7]   ;;  %s27_s16 = int_to_ptr.vmem [resolvable:$true] %s26_s16 }
   0x6   :  { %s36_s18 = sshll.u32 %s166_s17, 4  ;;  %s104_s19 = scalar_lea.vmem %s27_s16, 256  ;;  %s37_s18 = int_to_ptr.vmem [resolvable:$true] %s36_s18 }
   0x7   :  { %p105_p0 = scmp.ne.s32.totalorder %s27_s16, %s104_s19  ;;  %p109_p1 = scmp.lt.s32.totalorder %s27_s16, %s27_s16 }
   0x8   :  { %p110_p2 = scmp.lt.s32.totalorder %s104_s19, %s104_s19 }
   0xa   :  { %p111_p3 = por %p110_p2, %p109_p1 }
   0xc   :  { %p112_p4 = pnand %p111_p3, %p105_p0 }
   0xe   :  { %115 = shalt.err (!%p112_p4)
}
   0xf   :  { %29 = dma.hbm_to_vmem [thread:$0]  %s201_s1, 256, %s27_s16, [#allocation3]  }
  0x10   :  { %s124_s22 = scalar_lea.vmem %s37_s18, 256  ;;  %p129_p6 = scmp.lt.s32.totalorder %s37_s18, %s37_s18 }
  0x11   :  { %p125_p5 = scmp.ne.s32.totalorder %s37_s18, %s124_s22  ;;  %p130_p7 = scmp.lt.s32.totalorder %s124_s22, %s124_s22 }
  0x13   :  { %p131_p8 = por %p130_p7, %p129_p6 }
  0x15   :  { %p132_p9 = pnand %p131_p8, %p125_p5 }
  0x17   :  { %135 = shalt.err (!%p132_p9)
}
  0x18   :  { %39 = dma.hbm_to_vmem [thread:$0]  %s202_s2, 256, %s37_s18, [#allocation8]  }
  0x19   :  { %156 = dma.done.wait [#allocation5], 16  }
  0x1a   :  { %157 = vsyncadd [#allocation5], 4294967280 }
  0x1b   :  { %158 = dma.done.wait [#allocation3], 256  }
  0x1c   :  { %159 = vsyncadd [#allocation3], 4294967040 }
  0x1d   :  { %160 = dma.done.wait [#allocation8], 256  }
  0x1e   :  { %161 = vsyncadd [#allocation8], 4294967040 }
  0x1f   :  { %49 = sfence }
  0x20   :  { %s50_s1 = sld [smem:[#allocation2]]  ;;  %v52_v0 = vld [vmem:[#allocation6] sm:$0xff]  ;;  %v53_v1 = vld [vmem:[#allocation6 + $0x8] sm:$0xff]  ;;  %v57_v2 = vld [vmem:[#allocation7] sm:$0xff]  ;;  %s167_s25 = smov [#allocation9]  }
  0x21   :  { %s83_s24 = sld [smem:[#allocation2 + $0x1]]  ;;  %v58_v3 = vld [vmem:[#allocation7 + $0x8] sm:$0xff]  ;;  %s72_s26 = sshll.u32 %s167_s25, 4  ;;  %s73_s26 = int_to_ptr.vmem [resolvable:$true] %s72_s26 }
  0x22   :  { %s136_s2 = scalar_lea.vmem %s73_s26, 256  ;;  %p141_p11 = scmp.lt.s32.totalorder %s73_s26, %s73_s26 }
  0x23   :  { %p137_p10 = scmp.ne.s32.totalorder %s73_s26, %s136_s2  ;;  %p142_p12 = scmp.lt.s32.totalorder %s136_s2, %s136_s2 }
  0x25   :  { %p143_p13 = por %p142_p12, %p141_p11 }
  0x26   :  { %v54_v4 = vstv %s50_s1 }
  0x27   :  { %v55_v5 = vmul.f32 %v54_v4, %v52_v0  ;;  %v59_v6 = vstv %s83_s24  ;;  %v56_v7 = vmul.f32 %v54_v4, %v53_v1  ;;  %p144_p0 = pnand %p143_p13, %p137_p10 }
  0x28   :  { %v60_v8 = vmul.f32 %v59_v6, %v57_v2  ;;  %v61_v9 = vmul.f32 %v59_v6, %v58_v3 }
  0x2a   :  { %v62_v10 = vadd.f32 %v60_v8, %v55_v5  ;;  %v63_v11 = vadd.f32 %v61_v9, %v56_v7 }
  0x2c   :  { %64 = vst [vmem:[#allocation9] sm:$0xff] %v62_v10  ;;  %65 = vst [vmem:[#allocation9 + $0x8] sm:$0xff] %v63_v11 }
  0x2d   :  { %147 = shalt.err (!%p144_p0)
}
  0x2e   :  { %75 = dma.vmem_to_hbm [thread:$0]  %s73_s26, 256, %s203_s3, [#allocation4]  }
  0x2f   :  { %162 = dma.done.wait [#allocation4], 256  }
  0x30   :  { %163 = vsyncadd [#allocation4], 4294967040 }
  0x31   :  { %79 = vsyncpa [#allocation3], 1 }
  0x32   :  { %80 = vsyncpa [#allocation8], 1 }
  0x33   :  { %81 = vsyncpa [#allocation4], 1 }
  0x34   :  { %82 = vsyncpa [#allocation5], 1 }

</bundles_post_ra>
